<compile_context>
chip_gen: v5e
topology: v5e:2x2
jax: 0.10.0
libtpu: 0.0.40
codegen_flags: <defaults>
</compile_context>

<pallas_src>
import math

import jax
import jax.numpy as jnp
from jax.experimental import pallas as pl
from jax.experimental.pallas import tpu as pltpu


_MAX_BLOCK_ELEMS = 2 * 1024 * 1024  # 8 MiB per f32 buffer (v7x-safe)


def _sd_kernel(x_ref, o_ref):
    x = x_ref[...].astype(jnp.float32)
    # x + mask, where mask = 255 for x <= 0 and 0 for x > 0.
    xm = jnp.where(x > 0.0, x, x + 255.0)
    xm2 = xm * xm
    # tanh(-log(xm / 255)) == (255^2 - xm^2) / (255^2 + xm^2)   (exact identity)
    o_ref[...] = ((65025.0 - xm2) / (65025.0 + xm2)).astype(o_ref.dtype)


def _choose_2d(total, orig_shape):
    """Pick a lane-dense 2-D view (rows, cols) without any padding."""
    for cols in (1024, 512, 256, 128):
        if total % cols == 0:
            return total // cols, cols
    # Rare fallback (total not a multiple of 128): use the original trailing
    # dim as the (full-extent) lane dim. Correct, just uses partial stores.
    if len(orig_shape) >= 2 and orig_shape[-1] > 0:
        return total // orig_shape[-1], orig_shape[-1]
    return 1, total


def _block_rows_for(rows, cols):
    """Block rows: big enough to amortize step cost, small enough for VMEM,
    and (for mid-size inputs) split into >=2 steps for v7x's two cores."""
    max_rows = max(16, (_MAX_BLOCK_ELEMS // max(cols, 1)) // 16 * 16)
    if rows <= 16:
        return rows  # single full-extent block for tiny inputs
    if rows <= max_rows:
        half = -(-rows // 2)
        half = -(-half // 16) * 16  # keep sublane-dim a multiple of 16
        return rows if half >= rows else half
    return max_rows


def sd_layer_forward(x, W=None):
    """Forward pass of SDLayer.

    x: NCHW (or any-shape) tensor.
    W: the module's 3x3 parameter. PHI/PHI_INV are dead compute in the
       reference forward (output never uses them), so W is accepted for API
       fidelity but ignored.
    """
    del W  # dead in the reference forward pass

    orig_shape = x.shape
    total = math.prod(orig_shape)
    rows, cols = _choose_2d(total, orig_shape)
    block_rows = _block_rows_for(rows, cols)

    x2d = x.reshape(rows, cols)  # metadata-only reshape of contiguous input

    out2d = pl.pallas_call(
        _sd_kernel,
        out_shape=jax.ShapeDtypeStruct((rows, cols), jnp.float32),
        grid=(pl.cdiv(rows, block_rows),),
        in_specs=[pl.BlockSpec((block_rows, cols), lambda i: (i, 0))],
        out_specs=pl.BlockSpec((block_rows, cols), lambda i: (i, 0)),
        compiler_params=pltpu.CompilerParams(
            dimension_semantics=("parallel",),
            vmem_limit_bytes=48 << 20,   # <64 MiB: v7x-safe with headroom
        ),
        cost_estimate=pl.CostEstimate(
            flops=6 * total,
            transcendentals=0,
            bytes_accessed=total * (x.dtype.itemsize + 4),
        ),
    )(x2d)

    return out2d.reshape(orig_shape)


def _reference(x):
    mask = jnp.where(x > 0.0, 0.0, 255.0)
    return jnp.tanh(-jnp.log((x.astype(jnp.float32) + mask) / 255.0))


if __name__ == "__main__":
    key = jax.random.PRNGKey(0)
    kx, kw, kx2, kx3, kx4 = jax.random.split(key, 5)

    # Small deterministic NCHW input with 3 channels (W views to 3x3 => stain
    # matrix style module). Includes non-positive values to exercise the mask.
    x = jax.random.uniform(
        kx, (2, 3, 16, 16), dtype=jnp.float32, minval=-10.0, maxval=255.0
    )
    # Deterministic, invertible 3x3 parameter W (unused by the forward output).
    W = jnp.eye(3, dtype=jnp.float32) + 0.1 * jax.random.uniform(
        kw, (3, 3), dtype=jnp.float32
    )

    out = jax.block_until_ready(sd_layer_forward(x, W))
    assert out.shape == x.shape
    assert jnp.allclose(out, _reference(x), atol=1e-5, rtol=1e-5)

    # Larger input: lane-dense 1024-wide layout, 2-step parallel grid.
    x_big = jax.random.uniform(
        kx2, (4, 3, 256, 256), dtype=jnp.float32, minval=-10.0, maxval=255.0
    )
    out_big = jax.block_until_ready(sd_layer_forward(x_big, W))
    assert out_big.shape == x_big.shape
    assert jnp.allclose(out_big, _reference(x_big), atol=1e-5, rtol=1e-5)

    # Shape whose total is a multiple of 128 but not 1024: exercises the
    # ragged final block (masked by Pallas, no pre-padding).
    x_ragged = jax.random.uniform(
        kx3, (1, 3, 120, 80), dtype=jnp.float32, minval=-10.0, maxval=255.0
    )
    out_ragged = jax.block_until_ready(sd_layer_forward(x_ragged, W))
    assert out_ragged.shape == x_ragged.shape
    assert jnp.allclose(out_ragged, _reference(x_ragged), atol=1e-5, rtol=1e-5)

    # Awkward total (not a multiple of 128): full-extent lane-dim fallback.
    x_odd = jax.random.uniform(
        kx4, (2, 3, 5, 7), dtype=jnp.float32, minval=-10.0, maxval=255.0
    )
    out_odd = jax.block_until_ready(sd_layer_forward(x_odd, W))
    assert out_odd.shape == x_odd.shape
    assert jnp.allclose(out_odd, _reference(x_odd), atol=1e-5, rtol=1e-5)

    print("KERNEL_OK")
</pallas_src>

<mosaic_0001>
module attributes {stable_mosaic.version = 11 : i64} {
  func.func @_sd_kernel(%arg0: i32, %arg1: memref<3x512xf32, #tpu.memory_space<vmem>>, %arg2: memref<3x512xf32, #tpu.memory_space<vmem>>) attributes {dimension_semantics = [#tpu.dimension_semantics<parallel>], iteration_bounds = array<i64: 1>, scalar_prefetch = 0 : i64, scratch_operands = 0 : i64, tpu.core_type = #tpu.core_type<tc>, window_params = [{transform_indices = @transform_0, window_bounds = array<i64: 3, 512>}, {transform_indices = @transform_1, window_bounds = array<i64: 3, 512>}]} {
    %c0 = arith.constant 0 : index
    %c0_0 = arith.constant 0 : index
    %0 = vector.load %arg1[%c0, %c0_0] : memref<3x512xf32, #tpu.memory_space<vmem>>, vector<3x512xf32>
    %cst = arith.constant 0.000000e+00 : f32
    %1 = vector.broadcast %cst : f32 to vector<3x512xf32>
    %2 = arith.cmpf ogt, %0, %1 : vector<3x512xf32>
    %cst_1 = arith.constant 2.550000e+02 : f32
    %3 = vector.broadcast %cst_1 : f32 to vector<3x512xf32>
    %4 = arith.addf %0, %3 : vector<3x512xf32>
    %5 = arith.select %2, %0, %4 : vector<3x512xi1>, vector<3x512xf32>
    %6 = arith.mulf %5, %5 : vector<3x512xf32>
    %cst_2 = arith.constant 6.502500e+04 : f32
    %7 = vector.broadcast %cst_2 : f32 to vector<3x512xf32>
    %8 = arith.subf %7, %6 : vector<3x512xf32>
    %cst_3 = arith.constant 6.502500e+04 : f32
    %9 = vector.broadcast %cst_3 : f32 to vector<3x512xf32>
    %10 = arith.addf %9, %6 : vector<3x512xf32>
    %11 = arith.divf %8, %10 : vector<3x512xf32>
    %c0_4 = arith.constant 0 : index
    %c0_5 = arith.constant 0 : index
    %12 = vector.load %arg2[%c0_4, %c0_5] : memref<3x512xf32, #tpu.memory_space<vmem>>, vector<3x512xf32>
    tpu.vector_store %arg2[%c0_4, %c0_5], %11 {strides = array<i32>} : memref<3x512xf32, #tpu.memory_space<vmem>>, vector<3x512xf32>,
    return
  }
  func.func @transform_0(%arg0: i32) -> (i32, i32) {
    %c0_i32 = arith.constant 0 : i32
    %c0_i32_0 = arith.constant 0 : i32
    return %arg0, %c0_i32 : i32, i32
  }
  func.func @transform_1(%arg0: i32) -> (i32, i32) {
    %c0_i32 = arith.constant 0 : i32
    %c0_i32_0 = arith.constant 0 : i32
    return %arg0, %c0_i32 : i32, i32
  }
}

</mosaic_0001>

<bundles_post_ra>
// kernel: tpu_custom_call.1
= control target key start
LH: loop header
LB: loop body
LE: loop exit
PB: predicated region body
PF: predicated region fallthrough
CT: control target
= control target key end

     0   :  { %6 = vsyncpa [#allocation3], 0  ;;  %s168_s0 = inlined_call_operand.hbm [shape: f32[3,512], index: 0, kind: input, shape index: {}]   ;;  %s169_s1 = inlined_call_operand.hbm [shape: f32[3,512], index: 1, kind: output, shape index: {}]  }
   0x1   :  { %7 = vsyncpa [#allocation4], 0  ;;  %s13_s8 = sshll.u32 %s168_s0, 4  ;;  %s144_s9 = smov [#allocation2]   ;;  %s14_s8 = int_to_ptr.hbm [resolvable:$true] %s13_s8 }
   0x2   :  { %s15_s10 = sshll.u32 %s144_s9, 4  ;;  %s16_s10 = int_to_ptr.vmem [resolvable:$true] %s15_s10 }
   0x3   :  { %18 = dma.hbm_to_vmem [thread:$0]  %s14_s8, 256, %s16_s10, [#allocation3]  }
   0x4   :  { %140 = dma.done.wait [#allocation3], 256  }
   0x5   :  { %141 = vsyncadd [#allocation3], 4294967040  ;;  %v23_v0 = vld [vmem:[#allocation2] sm:$0x77]  ;;  %v24_v1 = vld [vmem:[#allocation2 + $0x8] sm:$0x77] }
   0x6   :  { %vm25_vm0 = vcmp.gt.f32.partialorder %v23_v0, 0.0  ;;  %v27_v2 = vadd.f32 255.0, %v23_v0  ;;  %vm26_vm1 = vcmp.gt.f32.partialorder %v24_v1, 0.0  ;;  %v28_v3 = vadd.f32 255.0, %v24_v1  ;;  %s145_s0 = smov [#allocation5]   ;;  %s76_s14 = sshll.u32 %s169_s1, 4  ;;  %s77_s14 = int_to_ptr.hbm [resolvable:$true] %s76_s14 }
   0x7   :  { %s74_s11 = sshll.u32 %s145_s0, 4  ;;  %s75_s11 = int_to_ptr.vmem [resolvable:$true] %s74_s11 }
   0x8   :  { %v29_v4 = vsel %vm25_vm0, %v23_v0, %v27_v2  ;;  %v30_v5 = vsel %vm26_vm1, %v24_v1, %v28_v3 }
   0x9   :  { %v31_v6 = vmul.f32 %v29_v4, %v29_v4  ;;  %v32_v7 = vmul.f32 %v30_v5, %v30_v5 }
   0xb   :  { %v35_v8 = vadd.f32 65025.0, %v31_v6  ;;  %v36_v9 = vadd.f32 65025.0, %v32_v7  ;;  %v33_v24 = vsub.f32 65025.0, %v31_v6 }
   0xc   :  { %v34_v27 = vsub.f32 65025.0, %v32_v7 }
   0xd   :  { %88 = vrcp.f32 %v35_v8  ;;  %vm42_vm2 = vweird.f32 %v35_v8  ;;  %v48_v13 = vand.u32 2147483648, %v35_v8  ;;  %v46_v16 = vand.u32 2147483647, %v35_v8 }
   0xe   :  { %90 = vrcp.f32 %v36_v9  ;;  %v63_v17 = vand.u32 2147483648, %v36_v9  ;;  %vm57_vm4 = vweird.f32 %v36_v9  ;;  %v61_v19 = vand.u32 2147483647, %v36_v9 }
   0xf   :  { %v49_v22 = vor.u32 1.1754944e-38, %v48_v13  ;;  %vm47_vm7 = vcmp.eq.f32.partialorder %v46_v16, 8.507059e+37 }
  0x10   :  { %v64_v26 = vor.u32 1.1754944e-38, %v63_v17  ;;  %vm62_vm9 = vcmp.eq.f32.partialorder %v61_v19, 8.507059e+37 }
  0x13   :  { %v89_v10 = vpop.eup %88 }
  0x14   :  { %v91_v11 = vpop.eup %90  ;;  %v38_v12 = vmul.f32 %v89_v10, %v35_v8  ;;  %vm43_vm3 = vweird.f32 %v89_v10 }
  0x15   :  { %v53_v14 = vmul.f32 %v91_v11, %v36_v9  ;;  %vm58_vm5 = vweird.f32 %v91_v11  ;;  %vm159_vm6 = vmor %vm42_vm2, %vm43_vm3 }
  0x16   :  { %v39_v15 = vsub.f32 1.0, %v38_v12  ;;  %vm59_vm8 = vmor %vm57_vm4, %vm58_vm5 }
  0x17   :  { %v54_v18 = vsub.f32 1.0, %v53_v14 }
  0x18   :  { %v40_v20 = vmul.f32 %v89_v10, %v39_v15 }
  0x19   :  { %v55_v23 = vmul.f32 %v91_v11, %v54_v18 }
  0x1a   :  { %v41_v25 = vadd.f32 %v89_v10, %v40_v20 }
  0x1b   :  { %v56_v28 = vadd.f32 %v91_v11, %v55_v23 }
  0x1c   :  { %v45_v29 = vsel %vm159_vm6, %v89_v10, %v41_v25 }
  0x1d   :  { %v50_v30 = vsel %vm47_vm7, %v49_v22, %v45_v29  ;;  %v60_v31 = vsel %vm59_vm8, %v91_v11, %v56_v28 }
  0x1e   :  { %v51_v32 = vmul.f32 %v50_v30, %v33_v24  ;;  %v65_v33 = vsel %vm62_vm9, %v64_v26, %v60_v31 }
  0x1f   :  { %v66_v34 = vmul.f32 %v65_v33, %v34_v27 }
  0x20   :  { %67 = vst [vmem:[#allocation5] sm:$0x77] %v51_v32 }
  0x21   :  { %68 = vst [vmem:[#allocation5 + $0x8] sm:$0x77] %v66_v34 }
  0x22   :  { %79 = dma.vmem_to_hbm [thread:$0]  %s75_s11, 256, %s77_s14, [#allocation4]  }
  0x23   :  { %142 = dma.done.wait [#allocation4], 256  }
  0x24   :  { %143 = vsyncadd [#allocation4], 4294967040 }
  0x25   :  { %84 = vsyncpa [#allocation3], 1 }
  0x26   :  { %85 = vsyncpa [#allocation4], 1 }

</bundles_post_ra>
